<compile_context>
chip_gen: v6e
topology: v6e:2x2x1
jax: 0.10.0
libtpu: 0.0.40
codegen_flags: <defaults>
</compile_context>

<pallas_src>
import functools
import math

import jax
import jax.numpy as jnp
from jax.experimental import pallas as pl
from jax.experimental.pallas import tpu as pltpu

LANE = 128
SUBLANE = 8
EPS = 1e-5


def _round_up(n, m):
    return ((n + m - 1) // m) * m


# --------------------------------------------------------------------------
# Pass 1: BatchNorm batch statistics (global over the true batch).
# Grid axis is a reduction ("arbitrary"); outputs are resident accumulators.
# --------------------------------------------------------------------------
def bn_stats_kernel(x_ref, mean_ref, inv_std_ref, *, n_valid, eps):
    i = pl.program_id(0)

    @pl.when(i == 0)
    def _init():
        mean_ref[...] = jnp.zeros_like(mean_ref)       # accumulates sum(x)
        inv_std_ref[...] = jnp.zeros_like(inv_std_ref)  # accumulates sum(x*x)

    x = x_ref[...].astype(jnp.float32)
    mean_ref[...] += jnp.sum(x, axis=0, keepdims=True)
    inv_std_ref[...] += jnp.sum(x * x, axis=0, keepdims=True)

    @pl.when(i == pl.num_programs(0) - 1)
    def _finalize():
        # Zero-padded batch rows contribute 0 to both sums -> divide by true B.
        mean = mean_ref[...] * (1.0 / n_valid)
        var = inv_std_ref[...] * (1.0 / n_valid) - mean * mean  # biased variance
        mean_ref[...] = mean
        inv_std_ref[...] = jax.lax.rsqrt(var + eps)


# --------------------------------------------------------------------------
# Pass 2: normalize (gamma/beta already folded into W1/b1) + 3x (Linear+ReLU).
# Batch-tiled "parallel" grid; weights resident via constant index_maps.
# --------------------------------------------------------------------------
def subnet_mlp_kernel(x_ref, mean_ref, inv_std_ref,
                      w1_ref, b1_ref, w2_ref, b2_ref, w3_ref, b3_ref,
                      o_ref):
    x = x_ref[...].astype(jnp.float32)                      # (TM, F_pad)
    xn = (x - mean_ref[...]) * inv_std_ref[...]             # BN core (f32 VPU)
    # Dropout: identity (eval semantics).

    cdt = w1_ref.dtype                                      # bf16 (or f32)
    y1 = jnp.dot(xn.astype(cdt), w1_ref[...],
                 preferred_element_type=jnp.float32) + b1_ref[...]
    y1 = jnp.maximum(y1, 0.0)

    y2 = jnp.dot(y1.astype(cdt), w2_ref[...],
                 preferred_element_type=jnp.float32) + b2_ref[...]
    y2 = jnp.maximum(y2, 0.0)

    y3 = jnp.dot(y2.astype(cdt), w3_ref[...],
                 preferred_element_type=jnp.float32) + b3_ref[...]
    y3 = jnp.maximum(y3, 0.0)

    o_ref[...] = y3.astype(o_ref.dtype)                     # lane-dense store


# --------------------------------------------------------------------------
# One-time parameter transform: fold BN affine into linear_1, pad to lane
# width, cast weights to the MXU compute dtype.
# --------------------------------------------------------------------------
def prepare_params(params, in_size, hidden_size, compute_dtype=jnp.bfloat16):
    f_pad = _round_up(in_size, LANE)
    h_pad = _round_up(hidden_size, LANE)

    gamma = params["gamma"].reshape(1, in_size).astype(jnp.float32)
    beta = params["beta"].reshape(1, in_size).astype(jnp.float32)
    w1, b1 = params["w1"].astype(jnp.float32), params["b1"].astype(jnp.float32)
    w2, b2 = params["w2"].astype(jnp.float32), params["b2"].astype(jnp.float32)
    w3, b3 = params["w3"].astype(jnp.float32), params["b3"].astype(jnp.float32)

    # normed @ W1 + b1 == ((x-mean)*inv_std) @ (gamma^T * W1) + (beta @ W1 + b1)
    w1f = gamma.reshape(in_size, 1) * w1
    b1f = b1 + beta @ w1

    def pad2(a, rows, cols):
        return jnp.pad(a, ((0, rows - a.shape[0]), (0, cols - a.shape[1])))

    return {
        "w1": pad2(w1f, f_pad, h_pad).astype(compute_dtype),
        "b1": pad2(b1f, 1, h_pad).astype(jnp.float32),
        "w2": pad2(w2, h_pad, h_pad).astype(compute_dtype),
        "b2": pad2(b2, 1, h_pad).astype(jnp.float32),
        "w3": pad2(w3, h_pad, h_pad).astype(compute_dtype),
        "b3": pad2(b3, 1, h_pad).astype(jnp.float32),
    }


# --------------------------------------------------------------------------
# Wrapper: pad x, run stats pass then MLP pass, slice the valid output.
# --------------------------------------------------------------------------
def subnet_forward(x, p, hidden_size, *, block_m=256):
    batch, in_size = x.shape
    f_pad, h_pad = p["w1"].shape

    tm = min(block_m, _round_up(batch, SUBLANE))     # batch tile (multiple of 8)
    b_pad = _round_up(batch, tm)
    n_tiles = b_pad // tm

    xp = jnp.pad(x.astype(jnp.float32),
                 ((0, b_pad - batch), (0, f_pad - in_size)))

    # ---- Pass 1: global batch statistics ----
    mean, inv_std = pl.pallas_call(
        functools.partial(bn_stats_kernel, n_valid=float(batch), eps=EPS),
        out_shape=(jax.ShapeDtypeStruct((1, f_pad), jnp.float32),
                   jax.ShapeDtypeStruct((1, f_pad), jnp.float32)),
        grid_spec=pltpu.PrefetchScalarGridSpec(
            num_scalar_prefetch=0,
            grid=(n_tiles,),
            in_specs=[pl.BlockSpec((tm, f_pad), lambda i: (i, 0))],
            out_specs=(pl.BlockSpec((1, f_pad), lambda i: (0, 0)),
                       pl.BlockSpec((1, f_pad), lambda i: (0, 0)))),
        compiler_params=pltpu.CompilerParams(
            dimension_semantics=("arbitrary",),
            vmem_limit_bytes=32 * 1024 * 1024),
    )(xp)

    # ---- Pass 2: normalize + 3-layer MLP ----
    flops = 2 * b_pad * (f_pad * h_pad + 2 * h_pad * h_pad)
    bytes_accessed = int(
        xp.size * 4 + b_pad * h_pad * 4 + 2 * f_pad * 4
        + sum(int(p[k].size) * p[k].dtype.itemsize
              for k in ("w1", "w2", "w3", "b1", "b2", "b3")))

    out = pl.pallas_call(
        subnet_mlp_kernel,
        out_shape=jax.ShapeDtypeStruct((b_pad, h_pad), jnp.float32),
        grid_spec=pltpu.PrefetchScalarGridSpec(
            num_scalar_prefetch=0,
            grid=(n_tiles,),
            in_specs=[
                pl.BlockSpec((tm, f_pad), lambda i: (i, 0)),     # x tile
                pl.BlockSpec((1, f_pad), lambda i: (0, 0)),      # mean (resident)
                pl.BlockSpec((1, f_pad), lambda i: (0, 0)),      # inv_std
                pl.BlockSpec((f_pad, h_pad), lambda i: (0, 0)),  # W1 (resident)
                pl.BlockSpec((1, h_pad), lambda i: (0, 0)),      # b1
                pl.BlockSpec((h_pad, h_pad), lambda i: (0, 0)),  # W2
                pl.BlockSpec((1, h_pad), lambda i: (0, 0)),      # b2
                pl.BlockSpec((h_pad, h_pad), lambda i: (0, 0)),  # W3
                pl.BlockSpec((1, h_pad), lambda i: (0, 0)),      # b3
            ],
            out_specs=pl.BlockSpec((tm, h_pad), lambda i: (i, 0))),
        compiler_params=pltpu.CompilerParams(
            dimension_semantics=("parallel",),
            vmem_limit_bytes=32 * 1024 * 1024),
        cost_estimate=pl.CostEstimate(flops=flops, transcendentals=0,
                                      bytes_accessed=bytes_accessed),
    )(xp, mean, inv_std,
      p["w1"], p["b1"], p["w2"], p["b2"], p["w3"], p["b3"])

    return out[:batch, :hidden_size]


# --------------------------------------------------------------------------
# Parameter init mirroring PyTorch defaults (uniform +-1/sqrt(fan_in)).
# Weights stored pre-transposed as (fan_in, fan_out) so kernels compute x @ W.
# --------------------------------------------------------------------------
def init_params(key, in_size, hidden_size):
    k1, k2, k3, k4, k5, k6 = jax.random.split(key, 6)

    def linear_init(kw, kb, fan_in, fan_out):
        bound = 1.0 / math.sqrt(fan_in)
        w = jax.random.uniform(kw, (fan_in, fan_out), jnp.float32, -bound, bound)
        b = jax.random.uniform(kb, (1, fan_out), jnp.float32, -bound, bound)
        return w, b

    w1, b1 = linear_init(k1, k2, in_size, hidden_size)
    w2, b2 = linear_init(k3, k4, hidden_size, hidden_size)
    w3, b3 = linear_init(k5, k6, hidden_size, hidden_size)
    return {
        "gamma": jnp.ones((1, in_size), jnp.float32),   # BN weight init = 1
        "beta": jnp.zeros((1, in_size), jnp.float32),   # BN bias init = 0
        "w1": w1, "b1": b1, "w2": w2, "b2": b2, "w3": w3, "b3": b3,
    }


# --------------------------------------------------------------------------
# References.
# --------------------------------------------------------------------------
def _reference(x, p):
    """Unfolded, unpadded f32 reference (faithful to the PyTorch forward)."""
    mean = jnp.mean(x, axis=0, keepdims=True)
    var = jnp.mean((x - mean) ** 2, axis=0, keepdims=True)
    normed = (x - mean) * jax.lax.rsqrt(var + EPS) * p["gamma"] + p["beta"]
    y1 = jnp.maximum(normed @ p["w1"] + p["b1"], 0.0)
    y2 = jnp.maximum(y1 @ p["w2"] + p["b2"], 0.0)
    y3 = jnp.maximum(y2 @ p["w3"] + p["b3"], 0.0)
    return y3


def _reference_matched(x, p, in_size, hidden_size):
    """Mirrors the kernel numerics (padding, folded params, compute dtype)."""
    batch = x.shape[0]
    f_pad, _ = p["w1"].shape
    xp = jnp.pad(x.astype(jnp.float32), ((0, 0), (0, f_pad - in_size)))
    s = jnp.sum(xp, axis=0, keepdims=True)
    sq = jnp.sum(xp * xp, axis=0, keepdims=True)
    mean = s / batch
    var = sq / batch - mean * mean
    inv_std = jax.lax.rsqrt(var + EPS)
    xn = (xp - mean) * inv_std
    cdt = p["w1"].dtype
    y1 = jnp.maximum(jnp.dot(xn.astype(cdt), p["w1"],
                             preferred_element_type=jnp.float32) + p["b1"], 0.0)
    y2 = jnp.maximum(jnp.dot(y1.astype(cdt), p["w2"],
                             preferred_element_type=jnp.float32) + p["b2"], 0.0)
    y3 = jnp.maximum(jnp.dot(y2.astype(cdt), p["w3"],
                             preferred_element_type=jnp.float32) + p["b3"], 0.0)
    return y3[:, :hidden_size]


if __name__ == "__main__":
    batch, in_size, hidden_size, dropout = 8, 16, 32, 0.2

    key = jax.random.PRNGKey(0)
    kx, kp, kg, kb = jax.random.split(key, 4)
    x = jax.random.normal(kx, (batch, in_size), jnp.float32)
    params = init_params(kp, in_size, hidden_size)
    # Non-trivial BN affine so the gamma/beta -> W1/b1 fold is actually exercised
    # (PyTorch default init is gamma=1, beta=0, which makes folding a no-op).
    params["gamma"] = jax.random.uniform(kg, (1, in_size), jnp.float32, 0.5, 1.5)
    params["beta"] = 0.1 * jax.random.normal(kb, (1, in_size), jnp.float32)

    ref = _reference(x, params)

    # f32 compute path: tight check against the unfolded / unpadded reference.
    p32 = prepare_params(params, in_size, hidden_size, compute_dtype=jnp.float32)
    out32 = jax.block_until_ready(subnet_forward(x, p32, hidden_size))
    assert out32.shape == (batch, hidden_size)
    assert jnp.allclose(out32, ref, atol=1e-4, rtol=1e-4), (
        "f32 kernel mismatch vs reference: max|diff|="
        + str(float(jnp.max(jnp.abs(out32 - ref)))))

    # bf16 compute path (MXU-friendly): check against a matched-precision ref.
    pbf = prepare_params(params, in_size, hidden_size, compute_dtype=jnp.bfloat16)
    outbf = jax.block_until_ready(subnet_forward(x, pbf, hidden_size))
    refbf = _reference_matched(x, pbf, in_size, hidden_size)
    assert outbf.shape == (batch, hidden_size)
    assert jnp.allclose(outbf, refbf, atol=5e-3, rtol=5e-3), (
        "bf16 kernel mismatch vs matched reference: max|diff|="
        + str(float(jnp.max(jnp.abs(outbf - refbf)))))

    print("KERNEL_OK")
</pallas_src>

<mosaic_0001>
module attributes {stable_mosaic.version = 11 : i64} {
  func.func @bn_stats_kernel(%arg0: i32, %arg1: memref<8x128xf32, #tpu.memory_space<vmem>>, %arg2: memref<1x128xf32, #tpu.memory_space<vmem>>, %arg3: memref<1x128xf32, #tpu.memory_space<vmem>>) attributes {dimension_semantics = [#tpu.dimension_semantics<arbitrary>], iteration_bounds = array<i64: 1>, scalar_prefetch = 0 : i64, scratch_operands = 0 : i64, tpu.core_type = #tpu.core_type<tc>, window_params = [{transform_indices = @transform_0, window_bounds = array<i64: 8, 128>}, {pipeline_mode = #tpu.pipeline_mode<synchronous>, transform_indices = @transform_1, window_bounds = array<i64: 1, 128>}, {pipeline_mode = #tpu.pipeline_mode<synchronous>, transform_indices = @transform_2, window_bounds = array<i64: 1, 128>}]} {
    %c0_i32 = arith.constant 0 : i32
    %0 = arith.cmpi eq, %arg0, %c0_i32 : i32
    %1 = arith.extui %0 : i1 to i32
    %c0_i32_0 = arith.constant 0 : i32
    %2 = arith.cmpi ne, %1, %c0_i32_0 : i32
    scf.if %2 {
      %cst_13 = arith.constant 0.000000e+00 : f32
      %18 = vector.broadcast %cst_13 : f32 to vector<1x128xf32>
      %c0_14 = arith.constant 0 : index
      %c0_15 = arith.constant 0 : index
      %19 = vector.load %arg2[%c0_14, %c0_15] : memref<1x128xf32, #tpu.memory_space<vmem>>, vector<1x128xf32>
      tpu.vector_store %arg2[%c0_14, %c0_15], %18 {strides = array<i32>} : memref<1x128xf32, #tpu.memory_space<vmem>>, vector<1x128xf32>,
      %cst_16 = arith.constant 0.000000e+00 : f32
      %20 = vector.broadcast %cst_16 : f32 to vector<1x128xf32>
      %c0_17 = arith.constant 0 : index
      %c0_18 = arith.constant 0 : index
      %21 = vector.load %arg3[%c0_17, %c0_18] : memref<1x128xf32, #tpu.memory_space<vmem>>, vector<1x128xf32>
      tpu.vector_store %arg3[%c0_17, %c0_18], %20 {strides = array<i32>} : memref<1x128xf32, #tpu.memory_space<vmem>>, vector<1x128xf32>,
    } else {
    }
    %c0 = arith.constant 0 : index
    %c0_1 = arith.constant 0 : index
    %3 = vector.load %arg1[%c0, %c0_1] : memref<8x128xf32, #tpu.memory_space<vmem>>, vector<8x128xf32>
    %c0_2 = arith.constant 0 : index
    %c0_3 = arith.constant 0 : index
    %4 = vector.load %arg2[%c0_2, %c0_3] : memref<1x128xf32, #tpu.memory_space<vmem>>, vector<1x128xf32>
    %cst = arith.constant dense<0.000000e+00> : vector<128xf32>
    %5 = vector.multi_reduction <add>, %3, %cst [0] : vector<8x128xf32> to vector<128xf32>
    %6 = vector.shape_cast %5 : vector<128xf32> to vector<1x128xf32>
    %7 = arith.addf %4, %6 : vector<1x128xf32>
    %c0_4 = arith.constant 0 : index
    %c0_5 = arith.constant 0 : index
    %8 = vector.load %arg2[%c0_4, %c0_5] : memref<1x128xf32, #tpu.memory_space<vmem>>, vector<1x128xf32>
    tpu.vector_store %arg2[%c0_4, %c0_5], %7 {strides = array<i32>} : memref<1x128xf32, #tpu.memory_space<vmem>>, vector<1x128xf32>,
    %c0_6 = arith.constant 0 : index
    %c0_7 = arith.constant 0 : index
    %9 = vector.load %arg3[%c0_6, %c0_7] : memref<1x128xf32, #tpu.memory_space<vmem>>, vector<1x128xf32>
    %10 = arith.mulf %3, %3 : vector<8x128xf32>
    %cst_8 = arith.constant dense<0.000000e+00> : vector<128xf32>
    %11 = vector.multi_reduction <add>, %10, %cst_8 [0] : vector<8x128xf32> to vector<128xf32>
    %12 = vector.shape_cast %11 : vector<128xf32> to vector<1x128xf32>
    %13 = arith.addf %9, %12 : vector<1x128xf32>
    %c0_9 = arith.constant 0 : index
    %c0_10 = arith.constant 0 : index
    %14 = vector.load %arg3[%c0_9, %c0_10] : memref<1x128xf32, #tpu.memory_space<vmem>>, vector<1x128xf32>
    tpu.vector_store %arg3[%c0_9, %c0_10], %13 {strides = array<i32>} : memref<1x128xf32, #tpu.memory_space<vmem>>, vector<1x128xf32>,
    %c0_i32_11 = arith.constant 0 : i32
    %15 = arith.cmpi eq, %arg0, %c0_i32_11 : i32
    %16 = arith.extui %15 : i1 to i32
    %c0_i32_12 = arith.constant 0 : i32
    %17 = arith.cmpi ne, %16, %c0_i32_12 : i32
    scf.if %17 {
      %c0_13 = arith.constant 0 : index
      %c0_14 = arith.constant 0 : index
      %18 = vector.load %arg2[%c0_13, %c0_14] : memref<1x128xf32, #tpu.memory_space<vmem>>, vector<1x128xf32>
      %cst_15 = arith.constant 1.250000e-01 : f32
      %19 = vector.broadcast %cst_15 : f32 to vector<1x128xf32>
      %20 = arith.mulf %18, %19 : vector<1x128xf32>
      %c0_16 = arith.constant 0 : index
      %c0_17 = arith.constant 0 : index
      %21 = vector.load %arg3[%c0_16, %c0_17] : memref<1x128xf32, #tpu.memory_space<vmem>>, vector<1x128xf32>
      %cst_18 = arith.constant 1.250000e-01 : f32
      %22 = vector.broadcast %cst_18 : f32 to vector<1x128xf32>
      %23 = arith.mulf %21, %22 : vector<1x128xf32>
      %24 = arith.mulf %20, %20 : vector<1x128xf32>
      %25 = arith.subf %23, %24 : vector<1x128xf32>
      %c0_19 = arith.constant 0 : index
      %c0_20 = arith.constant 0 : index
      %26 = vector.load %arg2[%c0_19, %c0_20] : memref<1x128xf32, #tpu.memory_space<vmem>>, vector<1x128xf32>
      tpu.vector_store %arg2[%c0_19, %c0_20], %20 {strides = array<i32>} : memref<1x128xf32, #tpu.memory_space<vmem>>, vector<1x128xf32>,
      %cst_21 = arith.constant 9.99999974E-6 : f32
      %27 = vector.broadcast %cst_21 : f32 to vector<1x128xf32>
      %28 = arith.addf %25, %27 : vector<1x128xf32>
      %29 = math.rsqrt %28 : vector<1x128xf32>
      %c0_22 = arith.constant 0 : index
      %c0_23 = arith.constant 0 : index
      %30 = vector.load %arg3[%c0_22, %c0_23] : memref<1x128xf32, #tpu.memory_space<vmem>>, vector<1x128xf32>
      tpu.vector_store %arg3[%c0_22, %c0_23], %29 {strides = array<i32>} : memref<1x128xf32, #tpu.memory_space<vmem>>, vector<1x128xf32>,
    } else {
    }
    return
  }
  func.func @transform_0(%arg0: i32) -> (i32, i32) {
    %c0_i32 = arith.constant 0 : i32
    %c0_i32_0 = arith.constant 0 : i32
    return %arg0, %c0_i32 : i32, i32
  }
  func.func @transform_1(%arg0: i32) -> (i32, i32) {
    %c0_i32 = arith.constant 0 : i32
    %c0_i32_0 = arith.constant 0 : i32
    %c0_i32_1 = arith.constant 0 : i32
    return %c0_i32, %c0_i32_0 : i32, i32
  }
  func.func @transform_2(%arg0: i32) -> (i32, i32) {
    %c0_i32 = arith.constant 0 : i32
    %c0_i32_0 = arith.constant 0 : i32
    %c0_i32_1 = arith.constant 0 : i32
    return %c0_i32, %c0_i32_0 : i32, i32
  }
}

</mosaic_0001>

<bundles_post_ra>
// kernel: tpu_custom_call.1
= control target key start
LH: loop header
LB: loop body
LE: loop exit
PB: predicated region body
PF: predicated region fallthrough
CT: control target
= control target key end

     0   :  { %8 = vsyncpa [#allocation3], 0  ;;  %s192_s0 = inlined_call_operand.hbm [shape: f32[8,128], index: 0, kind: input, shape index: {}]   ;;  %s193_s1 = inlined_call_operand.hbm [shape: f32[1,128], index: 1, kind: output, shape index: {0}]   ;;  %s194_s2 = inlined_call_operand.hbm [shape: f32[1,128], index: 2, kind: output, shape index: {1}]  }
   0x1   :  { %9 = vsyncpa [#allocation4], 0 }
   0x2   :  { %10 = vsyncpa [#allocation7], 0  ;;  %s164_s9 = smov [#allocation2]  }
   0x3   :  { %s17_s10 = sshll.u32 %s164_s9, 4  ;;  %s18_s10 = int_to_ptr.vmem [resolvable:$true] %s17_s10 }
   0x4   :  { %s106_s11 = scalar_lea.vmem %s18_s10, 128  ;;  %p111_p1 = scmp.lt.s32.totalorder %s18_s10, %s18_s10 }
   0x5   :  { %p107_p0 = scmp.ne.s32.totalorder %s18_s10, %s106_s11  ;;  %p112_p2 = scmp.lt.s32.totalorder %s106_s11, %s106_s11 }
   0x7   :  { %p113_p3 = por %p112_p2, %p111_p1 }
   0x9   :  { %p114_p4 = pnand %p113_p3, %p107_p0 }
   0xb   :  { %117 = shalt.err (!%p114_p4)
}
   0xc   :  { %20 = dma.hbm_to_vmem [thread:$0]  %s192_s0, 128, %s18_s10, [#allocation3]  }
   0xd   :  { %158 = dma.done.wait [#allocation3], 128  }
   0xe   :  { %159 = vsyncadd [#allocation3], 4294967168  ;;  %v165_v0 = vmov 0.0   ;;  %v30_v1 = vld [vmem:[#allocation2] sm:$0xff]  ;;  %s166_s0 = smov [#allocation5]  }
   0xf   :  { %28 = vst [vmem:[#allocation5] sm:$0x1] %v165_v0  ;;  %29 = vst [vmem:[#allocation6] sm:$0x1] %v165_v0  ;;  %v32_v2 = vrot.slane %v30_v1, 4  ;;  %v41_v3 = vmul.f32 %v30_v1, %v30_v1  ;;  %s69_s14 = sshll.u32 %s166_s0, 4  ;;  %s70_s14 = int_to_ptr.vmem [resolvable:$true] %s69_s14 }
  0x10   :  { %s118_s15 = scalar_lea.vmem %s70_s14, 16  ;;  %s122_s16 = scalar_lea.vmem %s70_s14, 32 }
  0x11   :  { %v33_v4 = vadd.f32 %v32_v2, %v30_v1  ;;  %v42_v5 = vrot.slane %v41_v3, 4  ;;  %p119_p5 = scmp.ne.s32.totalorder %s70_s14, %s118_s15  ;;  %p123_p6 = scmp.lt.s32.totalorder %s70_s14, %s70_s14 }
  0x12   :  { %p124_p7 = scmp.lt.s32.totalorder %s122_s16, %s118_s15 }
  0x13   :  { %v34_v6 = vrot.slane %v33_v4, 2  ;;  %v43_v7 = vadd.f32 %v42_v5, %v41_v3 }
  0x14   :  { %p125_p8 = por %p124_p7, %p123_p6 }
  0x15   :  { %v35_v8 = vadd.f32 %v34_v6, %v33_v4  ;;  %v44_v9 = vrot.slane %v43_v7, 2 }
  0x16   :  { %v31_v12 = vld [vmem:[#allocation5] sm:$0x1]  ;;  %v40_v15 = vld [vmem:[#allocation6] sm:$0x1]  ;;  %p126_p9 = pnand %p125_p8, %p119_p5 }
  0x17   :  { %v36_v10 = vrot.slane %v35_v8, 1  ;;  %v45_v11 = vadd.f32 %v44_v9, %v43_v7 }
  0x19   :  { %v37_v13 = vadd.f32 %v36_v10, %v35_v8  ;;  %v46_v14 = vrot.slane %v45_v11, 1 }
  0x1b   :  { %v38_v16 = vadd.f32 %v37_v13, %v31_v12  ;;  %v47_v17 = vadd.f32 %v46_v14, %v45_v11 }
  0x1d   :  { %39 = vst [vmem:[#allocation5] sm:$0x1] %v38_v16  ;;  %v48_v18 = vadd.f32 %v47_v17, %v40_v15 }
  0x1f   :  { %49 = vst [vmem:[#allocation6] sm:$0x1] %v48_v18 }
  0x24   :  { %v53_v19 = vld [vmem:[#allocation5] sm:$0x1] }
  0x25   :  { %v54_v20 = vmul.f32 0.125, %v53_v19 }
  0x26   :  { %v55_v21 = vld [vmem:[#allocation6] sm:$0x1] }
  0x27   :  { %v57_v22 = vmul.f32 %v54_v20, %v54_v20  ;;  %59 = vst [vmem:[#allocation5] sm:$0x1] %v54_v20  ;;  %v56_v23 = vmul.f32 0.125, %v55_v21 }
  0x28   :  { %129 = shalt.err (!%p126_p9)
}
  0x29   :  { %72 = dma.vmem_to_hbm [thread:$0]  %s70_s14, 16, %s193_s1, [#allocation4]   ;;  %v58_v24 = vsub.f32 %v56_v23, %v57_v22 }
  0x2a   :  { %s167_s19 = smov [#allocation6]  }
  0x2b   :  { %v60_v25 = vadd.f32 1e-05, %v58_v24  ;;  %s79_s20 = sshll.u32 %s167_s19, 4  ;;  %s80_s20 = int_to_ptr.vmem [resolvable:$true] %s79_s20 }
  0x2c   :  { %s138_s21 = scalar_lea.vmem %s80_s20, 16  ;;  %s142_s22 = scalar_lea.vmem %s80_s20, 32 }
  0x2d   :  { %96 = vrsqrt.f32 %v60_v25  ;;  %p139_p10 = scmp.ne.s32.totalorder %s80_s20, %s138_s21  ;;  %p143_p11 = scmp.lt.s32.totalorder %s80_s20, %s80_s20 }
  0x2e   :  { %p144_p12 = scmp.lt.s32.totalorder %s142_s22, %s138_s21 }
  0x30   :  { %p145_p13 = por %p144_p12, %p143_p11 }
  0x32   :  { %p146_p0 = pnand %p145_p13, %p139_p10 }
  0x3a   :  { %v97_v26 = vpop.eup %96 }
  0x3b   :  { %62 = vst [vmem:[#allocation6] sm:$0x1] %v97_v26 }
  0x3c   :  { %149 = shalt.err (!%p146_p0)
}
  0x3d   :  { %82 = dma.vmem_to_hbm [thread:$0]  %s80_s20, 16, %s194_s2, [#allocation7]  }
  0x3e   :  { %160 = dma.done.wait [#allocation4], 16  }
  0x3f   :  { %161 = vsyncadd [#allocation4], 4294967280 }
  0x40   :  { %162 = dma.done.wait [#allocation7], 16  }
  0x41   :  { %163 = vsyncadd [#allocation7], 4294967280 }
  0x42   :  { %89 = vsyncpa [#allocation3], 1 }
  0x43   :  { %90 = vsyncpa [#allocation4], 1 }
  0x44   :  { %91 = vsyncpa [#allocation7], 1 }

</bundles_post_ra>
